<compile_context>
chip_gen: v5e
topology: v5e:2x2
jax: 0.10.0
libtpu: 0.0.40
codegen_flags: <defaults>
</compile_context>

<pallas_src>
import math

import jax
import jax.numpy as jnp
from jax import lax
from jax.experimental import pallas as pl
from jax.experimental.pallas import tpu as pltpu

_LANE = 128            # lane-dense last dim (unmasked vst)
_ROWS_PER_TILE = 2048  # 2048 x 128 x 4B = 1 MiB per operand per block


def _sumsq_kernel(x_ref, o_ref):
    """Tiled reduction: o[0, 0] = sum(x * x) over all tiles (o stays resident)."""
    @pl.when(pl.program_id(0) == 0)
    def _():
        o_ref[...] = jnp.zeros_like(o_ref)

    x = x_ref[...]
    o_ref[...] += jnp.sum(x * x)


def _awgn_add_kernel(std_ref, x_ref, bits_ref, o_ref):
    """Tiled elementwise: o = x + std * N(0,1), paired Box-Muller in-kernel."""
    std = std_ref[0]                       # f32 scalar from SMEM (scalar prefetch)
    half = x_ref.shape[0] // 2             # static, multiple of 8 sublanes

    def bits_to_unit(b):
        # 23 random mantissa bits -> float32 in [1, 2); subtract 1 -> [0, 1).
        mant = (b >> jnp.uint32(9)) | jnp.uint32(0x3F800000)
        return lax.bitcast_convert_type(mant, jnp.float32) - jnp.float32(1.0)

    u1 = jnp.float32(1.0) - bits_to_unit(bits_ref[:half, :])   # (0, 1] -> log safe
    u2 = bits_to_unit(bits_ref[half:, :])                      # [0, 1)

    r = jnp.sqrt(jnp.float32(-2.0) * jnp.log(u1))
    theta = jnp.float32(2.0 * math.pi) * u2
    # Use BOTH Box-Muller outputs: one log+sqrt per *two* normals.
    o_ref[:half, :] = x_ref[:half, :] + std * (r * jnp.cos(theta))
    o_ref[half:, :] = x_ref[half:, :] + std * (r * jnp.sin(theta))


@jax.jit
def apply_awgn(x: jax.Array, snr_db, seed) -> jax.Array:
    """Pallas implementation of ApplyAWGN.forward for a (2, N) float32 signal."""
    if x.ndim != 2 or x.shape[0] != 2 or x.dtype != jnp.float32:
        raise ValueError(f"ApplyAWGN expects float32 shape (2, N), got {x.shape} {x.dtype}")
    n = x.shape[1]
    total = 2 * n

    # ---- repack (2, N) into a dense, zero-padded (rows_padded, 128) slab ----
    rows = -(-total // _LANE)                                     # cdiv
    rows_per_tile = min(_ROWS_PER_TILE, ((rows + 15) // 16) * 16)  # mult of 16
    num_tiles = -(-rows // rows_per_tile)
    rows_padded = num_tiles * rows_per_tile
    padded_total = rows_padded * _LANE

    x_flat = jnp.pad(jnp.ravel(x), (0, padded_total - total))
    x2d = x_flat.reshape(rows_padded, _LANE)

    # ---- pass 1: sig_power = sum(x^2) / N (zero padding contributes 0) ------
    sumsq = pl.pallas_call(
        _sumsq_kernel,
        out_shape=jax.ShapeDtypeStruct((1, 1), jnp.float32),
        grid=(num_tiles,),
        in_specs=[pl.BlockSpec((rows_per_tile, _LANE), lambda i: (i, 0))],
        out_specs=pl.BlockSpec((1, 1), lambda i: (0, 0)),
        compiler_params=pltpu.CompilerParams(dimension_semantics=("arbitrary",)),
    )(x2d)[0, 0]

    sig_power = sumsq / jnp.float32(n)
    snr_lin = jnp.float32(10.0) ** (jnp.asarray(snr_db, jnp.float32) / jnp.float32(10.0))
    noise_power = sig_power / snr_lin
    std = jnp.sqrt(noise_power * jnp.float32(0.5)).reshape(1).astype(jnp.float32)

    # ---- uniform bits for the in-kernel Box-Muller (1 uint32 per element) ---
    # TODO(synk): on real hardware pltpu.prng_random_bits inside the kernel
    # would avoid streaming these bits from HBM, but those primitives have no
    # CPU/interpret lowering in this environment.
    key = jax.random.PRNGKey(seed)
    bits = jax.random.bits(key, (rows_padded, _LANE), jnp.uint32)

    # ---- pass 2: tiled, pipelined noise-add (std via scalar prefetch) -------
    out2d = pl.pallas_call(
        _awgn_add_kernel,
        out_shape=jax.ShapeDtypeStruct((rows_padded, _LANE), jnp.float32),
        grid_spec=pltpu.PrefetchScalarGridSpec(
            num_scalar_prefetch=1,                     # std -> SMEM
            grid=(num_tiles,),
            in_specs=[
                pl.BlockSpec((rows_per_tile, _LANE), lambda i, std: (i, 0)),
                pl.BlockSpec((rows_per_tile, _LANE), lambda i, std: (i, 0)),
            ],
            out_specs=pl.BlockSpec((rows_per_tile, _LANE), lambda i, std: (i, 0)),
        ),
        compiler_params=pltpu.CompilerParams(dimension_semantics=("parallel",)),
    )(std, x2d, bits)

    return out2d.reshape(-1)[:total].reshape(2, n)


if __name__ == "__main__":
    key = jax.random.PRNGKey(0)
    N = 1024
    snr_db = 10.0

    # Deterministic example input: an I/Q signal, shape (2, N) float32.
    x = jax.random.normal(key, (2, N), dtype=jnp.float32)

    y = apply_awgn(x, snr_db, 1234)
    y = jax.block_until_ready(y)

    # Sanity checks against the reference semantics.
    assert y.shape == (2, N) and y.dtype == jnp.float32
    assert bool(jnp.all(jnp.isfinite(y)))

    sig_power = float(jnp.mean(jnp.sum(x * x, axis=0)))
    expected_noise_power = sig_power / (10.0 ** (snr_db / 10.0))
    noise = y - x
    measured_noise_power = float(jnp.mean(jnp.sum(noise * noise, axis=0)))
    ratio = measured_noise_power / expected_noise_power
    assert 0.7 < ratio < 1.3, f"noise power ratio off: {ratio}"

    print("KERNEL_OK")
</pallas_src>

<mosaic_0001>
module attributes {stable_mosaic.version = 11 : i64} {
  func.func @_sumsq_kernel(%arg0: i32, %arg1: memref<16x128xf32, #tpu.memory_space<vmem>>, %arg2: memref<1x1xf32, #tpu.memory_space<vmem>>) attributes {dimension_semantics = [#tpu.dimension_semantics<arbitrary>], iteration_bounds = array<i64: 1>, scalar_prefetch = 0 : i64, scratch_operands = 0 : i64, tpu.core_type = #tpu.core_type<tc>, window_params = [{transform_indices = @transform_0, window_bounds = array<i64: 16, 128>}, {pipeline_mode = #tpu.pipeline_mode<synchronous>, transform_indices = @transform_1, window_bounds = array<i64: 1, 1>}]} {
    %c0_i32 = arith.constant 0 : i32
    %0 = arith.cmpi eq, %arg0, %c0_i32 : i32
    %1 = arith.extui %0 : i1 to i32
    %c0_i32_0 = arith.constant 0 : i32
    %2 = arith.cmpi ne, %1, %c0_i32_0 : i32
    scf.if %2 {
      %cst_6 = arith.constant 0.000000e+00 : f32
      %13 = vector.broadcast %cst_6 : f32 to vector<1x1xf32>
      %c0_7 = arith.constant 0 : index
      %c0_8 = arith.constant 0 : index
      %14 = vector.load %arg2[%c0_7, %c0_8] : memref<1x1xf32, #tpu.memory_space<vmem>>, vector<1x1xf32>
      tpu.vector_store %arg2[%c0_7, %c0_8], %13 {strides = array<i32>} : memref<1x1xf32, #tpu.memory_space<vmem>>, vector<1x1xf32>,
    } else {
    }
    %c0 = arith.constant 0 : index
    %c0_1 = arith.constant 0 : index
    %3 = vector.load %arg1[%c0, %c0_1] : memref<16x128xf32, #tpu.memory_space<vmem>>, vector<16x128xf32>
    %c0_2 = arith.constant 0 : index
    %c0_3 = arith.constant 0 : index
    %4 = vector.load %arg2[%c0_2, %c0_3] : memref<1x1xf32, #tpu.memory_space<vmem>>, vector<1x1xf32>
    %5 = arith.mulf %3, %3 : vector<16x128xf32>
    %6 = vector.shape_cast %5 : vector<16x128xf32> to vector<1x16x128xf32>
    %cst = arith.constant dense<0.000000e+00> : vector<1xf32>
    %7 = vector.multi_reduction <add>, %6, %cst [1, 2] : vector<1x16x128xf32> to vector<1xf32>
    %8 = vector.shape_cast %7 : vector<1xf32> to vector<1x1x1xf32>
    %9 = vector.extract %8[0, 0, 0] : f32 from vector<1x1x1xf32>
    %10 = vector.broadcast %9 : f32 to vector<1x1xf32>
    %11 = arith.addf %4, %10 : vector<1x1xf32>
    %c0_4 = arith.constant 0 : index
    %c0_5 = arith.constant 0 : index
    %12 = vector.load %arg2[%c0_4, %c0_5] : memref<1x1xf32, #tpu.memory_space<vmem>>, vector<1x1xf32>
    tpu.vector_store %arg2[%c0_4, %c0_5], %11 {strides = array<i32>} : memref<1x1xf32, #tpu.memory_space<vmem>>, vector<1x1xf32>,
    return
  }
  func.func @transform_0(%arg0: i32) -> (i32, i32) {
    %c0_i32 = arith.constant 0 : i32
    %c0_i32_0 = arith.constant 0 : i32
    return %arg0, %c0_i32 : i32, i32
  }
  func.func @transform_1(%arg0: i32) -> (i32, i32) {
    %c0_i32 = arith.constant 0 : i32
    %c0_i32_0 = arith.constant 0 : i32
    %c0_i32_1 = arith.constant 0 : i32
    return %c0_i32, %c0_i32_0 : i32, i32
  }
}

module attributes {stable_mosaic.version = 11 : i64} {
  func.func @_awgn_add_kernel(%arg0: i32, %arg1: memref<1xf32, #tpu.memory_space<smem>>, %arg2: memref<16x128xf32, #tpu.memory_space<vmem>>, %arg3: memref<16x128xi32, #tpu.memory_space<vmem>>, %arg4: memref<16x128xf32, #tpu.memory_space<vmem>>) attributes {dimension_semantics = [#tpu.dimension_semantics<parallel>], iteration_bounds = array<i64: 1>, scalar_prefetch = 1 : i64, scratch_operands = 0 : i64, tpu.core_type = #tpu.core_type<tc>, window_params = [{transform_indices = @transform_0, window_bounds = array<i64: 16, 128>}, {transform_indices = @transform_1, window_bounds = array<i64: 16, 128>}, {transform_indices = @transform_2, window_bounds = array<i64: 16, 128>}]} {
    %c0 = arith.constant 0 : index
    %0 = memref.load %arg1[%c0] : memref<1xf32, #tpu.memory_space<smem>>
    %c0_0 = arith.constant 0 : index
    %c0_1 = arith.constant 0 : index
    %1 = vector.load %arg3[%c0_0, %c0_1] : memref<16x128xi32, #tpu.memory_space<vmem>>, vector<8x128xi32>
    %c9_i32 = arith.constant 9 : i32
    %2 = vector.broadcast %c9_i32 : i32 to vector<8x128xi32>
    %3 = arith.shrui %1, %2 : vector<8x128xi32>
    %c1065353216_i32 = arith.constant 1065353216 : i32
    %4 = vector.broadcast %c1065353216_i32 : i32 to vector<8x128xi32>
    %5 = arith.ori %3, %4 : vector<8x128xi32>
    %6 = tpu.bitcast %5 : vector<8x128xi32> -> vector<8x128xf32>
    %cst = arith.constant 1.000000e+00 : f32
    %7 = vector.broadcast %cst : f32 to vector<8x128xf32>
    %8 = arith.subf %6, %7 : vector<8x128xf32>
    %cst_2 = arith.constant 1.000000e+00 : f32
    %9 = vector.broadcast %cst_2 : f32 to vector<8x128xf32>
    %10 = arith.subf %9, %8 : vector<8x128xf32>
    %c8 = arith.constant 8 : index
    %c0_3 = arith.constant 0 : index
    %11 = vector.load %arg3[%c8, %c0_3] : memref<16x128xi32, #tpu.memory_space<vmem>>, vector<8x128xi32>
    %c9_i32_4 = arith.constant 9 : i32
    %12 = vector.broadcast %c9_i32_4 : i32 to vector<8x128xi32>
    %13 = arith.shrui %11, %12 : vector<8x128xi32>
    %c1065353216_i32_5 = arith.constant 1065353216 : i32
    %14 = vector.broadcast %c1065353216_i32_5 : i32 to vector<8x128xi32>
    %15 = arith.ori %13, %14 : vector<8x128xi32>
    %16 = tpu.bitcast %15 : vector<8x128xi32> -> vector<8x128xf32>
    %cst_6 = arith.constant 1.000000e+00 : f32
    %17 = vector.broadcast %cst_6 : f32 to vector<8x128xf32>
    %18 = arith.subf %16, %17 : vector<8x128xf32>
    %19 = math.log %10 : vector<8x128xf32>
    %cst_7 = arith.constant -2.000000e+00 : f32
    %20 = vector.broadcast %cst_7 : f32 to vector<8x128xf32>
    %21 = arith.mulf %20, %19 : vector<8x128xf32>
    %22 = math.sqrt %21 : vector<8x128xf32>
    %cst_8 = arith.constant 6.28318548 : f32
    %23 = vector.broadcast %cst_8 : f32 to vector<8x128xf32>
    %24 = arith.mulf %23, %18 : vector<8x128xf32>
    %c0_9 = arith.constant 0 : index
    %c0_10 = arith.constant 0 : index
    %25 = vector.load %arg2[%c0_9, %c0_10] : memref<16x128xf32, #tpu.memory_space<vmem>>, vector<8x128xf32>
    %26 = math.cos %24 : vector<8x128xf32>
    %27 = arith.mulf %22, %26 : vector<8x128xf32>
    %28 = vector.broadcast %0 : f32 to vector<8x128xf32>
    %29 = arith.mulf %28, %27 : vector<8x128xf32>
    %30 = arith.addf %25, %29 : vector<8x128xf32>
    %c0_11 = arith.constant 0 : index
    %c0_12 = arith.constant 0 : index
    %31 = vector.load %arg4[%c0_11, %c0_12] : memref<16x128xf32, #tpu.memory_space<vmem>>, vector<8x128xf32>
    tpu.vector_store %arg4[%c0_11, %c0_12], %30 {strides = array<i32>} : memref<16x128xf32, #tpu.memory_space<vmem>>, vector<8x128xf32>,
    %c8_13 = arith.constant 8 : index
    %c0_14 = arith.constant 0 : index
    %32 = vector.load %arg2[%c8_13, %c0_14] : memref<16x128xf32, #tpu.memory_space<vmem>>, vector<8x128xf32>
    %33 = math.sin %24 : vector<8x128xf32>
    %34 = arith.mulf %22, %33 : vector<8x128xf32>
    %35 = vector.broadcast %0 : f32 to vector<8x128xf32>
    %36 = arith.mulf %35, %34 : vector<8x128xf32>
    %37 = arith.addf %32, %36 : vector<8x128xf32>
    %c8_15 = arith.constant 8 : index
    %c0_16 = arith.constant 0 : index
    %38 = vector.load %arg4[%c8_15, %c0_16] : memref<16x128xf32, #tpu.memory_space<vmem>>, vector<8x128xf32>
    tpu.vector_store %arg4[%c8_15, %c0_16], %37 {strides = array<i32>} : memref<16x128xf32, #tpu.memory_space<vmem>>, vector<8x128xf32>,
    return
  }
  func.func @transform_0(%arg0: i32, %arg1: memref<1xf32, #tpu.memory_space<smem>>) -> (i32, i32) {
    %c0_i32 = arith.constant 0 : i32
    %c0_i32_0 = arith.constant 0 : i32
    return %arg0, %c0_i32 : i32, i32
  }
  func.func @transform_1(%arg0: i32, %arg1: memref<1xf32, #tpu.memory_space<smem>>) -> (i32, i32) {
    %c0_i32 = arith.constant 0 : i32
    %c0_i32_0 = arith.constant 0 : i32
    return %arg0, %c0_i32 : i32, i32
  }
  func.func @transform_2(%arg0: i32, %arg1: memref<1xf32, #tpu.memory_space<smem>>) -> (i32, i32) {
    %c0_i32 = arith.constant 0 : i32
    %c0_i32_0 = arith.constant 0 : i32
    return %arg0, %c0_i32 : i32, i32
  }
}

</mosaic_0001>

<bundles_post_ra>
// kernel: apply_awgn.2
= control target key start
LH: loop header
LB: loop body
LE: loop exit
PB: predicated region body
PF: predicated region fallthrough
CT: control target
= control target key end

     0   :  { %s103_s0 = inlined_call_operand.vmem [shape: f32[16,128], index: 0, kind: input, shape index: {}]   ;;  %s104_s1 = inlined_call_operand.hbm [shape: f32[1,1], index: 1, kind: output, shape index: {}]  }
   0x1   :  { %v15_v0 = vld [vmem:[%s103_s0] sm:$0xff]  ;;  %v16_v1 = vld [vmem:[%s103_s0 + $0x8] sm:$0xff] }
   0x2   :  { %6 = vsyncpa [#allocation3], 0  ;;  %v18_v2 = vmul.f32 %v15_v0, %v15_v0  ;;  %v19_v3 = vmul.f32 %v16_v1, %v16_v1  ;;  %vm13_vm0 = vcmask 0   ;;  %v80_v5 = vmov 0.0   ;;  %s81_s10 = smov [#allocation2]   ;;  %s41_s13 = sshll.u32 %s104_s1, 4  ;;  %s42_s13 = int_to_ptr.hbm [resolvable:$true] %s41_s13 }
   0x3   :  { %14 = vst.msk [vmem:[#allocation2] sm:$0x1] %vm13_vm0, %v80_v5  ;;  %s39_s0 = sshll.u32 %s81_s10, 4  ;;  %s40_s0 = int_to_ptr.vmem [resolvable:$true] %s39_s0 }
   0x4   :  { %v20_v4 = vadd.f32 %v19_v3, %v18_v2 }
   0x6   :  { %21 = vadd.xlane.f32.xlu0 %v20_v4 }
   0xa   :  { %v17_v13 = vld [vmem:[#allocation2] sm:$0x1] }
  0x79   :  { %v22_v6 = vpop.xlane.xlu0 %21 }
  0x7a   :  { %v23_v7 = vrot.slane %v22_v6, 4 }
  0x7c   :  { %v24_v8 = vadd.f32 %v23_v7, %v22_v6 }
  0x7e   :  { %v25_v9 = vrot.slane %v24_v8, 2 }
  0x80   :  { %v26_v10 = vadd.f32 %v25_v9, %v24_v8 }
  0x82   :  { %v27_v11 = vrot.slane %v26_v10, 1 }
  0x84   :  { %v28_v12 = vadd.f32 %v27_v11, %v26_v10 }
  0x86   :  { %50 = vpush %v28_v12 }
  0xb7   :  { %s51_s14 = spop %50 }
  0xb8   :  { %v30_v14 = vstv %s51_s14 }
  0xb9   :  { %v31_v15 = vadd.f32 %v30_v14, %v17_v13 }
  0xbb   :  { %33 = vst.msk [vmem:[#allocation2] sm:$0x1] %vm13_vm0, %v31_v15 }
  0xbc   :  { %44 = dma.vmem_to_hbm [thread:$0]  %s40_s0, 16, %s42_s13, [#allocation3]  }
  0xbd   :  { %78 = dma.done.wait [#allocation3], 16  }
  0xbe   :  { %79 = vsyncadd [#allocation3], 4294967280 }
  0xbf   :  { %49 = vsyncpa [#allocation3], 1 }

// kernel: apply_awgn.3
= control target key start
LH: loop header
LB: loop body
LE: loop exit
PB: predicated region body
PF: predicated region fallthrough
CT: control target
= control target key end

     0   :  { %v384_v16 = vmov 683565275   ;;  %v385_v18 = vmov 2475754826   ;;  %v386_v20 = vmov 2131351028   ;;  %s487_s2 = inlined_call_operand.vmem [shape: u32[16,128], index: 2, kind: input, shape index: {}]   ;;  %s488_s0 = inlined_call_operand.<no memory space> [shape: f32[1], index: 0, kind: input, shape index: {}]   ;;  %s489_s1 = inlined_call_operand.vmem [shape: f32[16,128], index: 1, kind: input, shape index: {}]   ;;  %s490_s3 = inlined_call_operand.vmem [shape: f32[16,128], index: 3, kind: output, shape index: {}]  }
   0x1   :  { %v20_v0 = vld [vmem:[%s487_s2 + $0x8] sm:$0xff]  ;;  %v387_v22 = vmov 2102212464   ;;  %v388_v24 = vmov 920167782   ;;  %v14_v42 = vld [vmem:[%s487_s2] sm:$0xff] }
   0x2   :  { %v21_v1 = vshrl.u32 %v20_v0, 9  ;;  %v389_v30 = vmov 1326507024   ;;  %v15_v52 = vshrl.u32 %v14_v42, 9 }
   0x4   :  { %v22_v2 = vor.u32 1065353216, %v21_v1  ;;  %v16_v0 = vor.u32 1065353216, %v15_v52 }
   0x6   :  { %v366_v3 = vadd.f32 -1.0, %v22_v2 }
   0x8   :  { %v414_v4 = vmul.f32 6.2831855, %v366_v3 }
   0xa   :  { %v45_v5 = vand.u32 2139095040, %v414_v4  ;;  %v42_v7 = vand.u32 2147483647, %v414_v4  ;;  %vm44_vm12 = vcmp.lt.s32.totalorder %v414_v4, 0 }
   0xc   :  { %v46_v6 = vshrl.u32 %v45_v5, 23  ;;  %v49_v10 = vand.u32 8388607, %v42_v7  ;;  %vm43_vm13 = vcmp.le.f32.partialorder %v42_v7, 0.7853982 }
   0xe   :  { %v367_v8 = vadd.s32 4294967169, %v46_v6  ;;  %v50_v13 = vor.u32 8388608, %v49_v10 }
  0x10   :  { %v52_v9 = vadd.s32 1, %v367_v8  ;;  %v423_v32 = vshll.u32 %v50_v13, 8 }
  0x12   :  { %vm53_vm0 = vcmp.gt.s32.totalorder %v52_v9, 0  ;;  %v91_v45 = vand.u32 65535, %v423_v32  ;;  %v92_v46 = vshrl.u32 %v423_v32, 16 }
  0x13   :  { %v54_v11 = vsel %vm53_vm0, %v52_v9, 0  ;;  %v390_v9 = vmov 0  }
  0x14   :  { %v56_v12 = vand.u32 31, %v54_v11  ;;  %v420_v14 = vshrl.u32 %v54_v11, 5 }
  0x16   :  { %v57_v15 = vsub.s32 32, %v56_v12  ;;  %v59_v17 = vshll.u32 %v384_v16, %v56_v12  ;;  %v62_v19 = vshll.u32 %v385_v18, %v56_v12  ;;  %v65_v21 = vshll.u32 %v386_v20, %v56_v12 }
  0x17   :  { %v68_v23 = vshll.u32 %v387_v22, %v56_v12  ;;  %v71_v25 = vshll.u32 %v388_v24, %v56_v12  ;;  %vm74_vm1 = vcmp.lt.s32.totalorder %v420_v14, 1  ;;  %vm77_vm2 = vcmp.lt.s32.totalorder %v420_v14, 4 }
  0x18   :  { %v60_v26 = vshrl.u32 %v385_v18, %v57_v15  ;;  %v63_v27 = vshrl.u32 %v386_v20, %v57_v15  ;;  %v66_v28 = vshrl.u32 %v387_v22, %v57_v15  ;;  %v69_v29 = vshrl.u32 %v388_v24, %v57_v15 }
  0x19   :  { %v72_v31 = vshrl.u32 %v389_v30, %v57_v15  ;;  %vm76_vm3 = vcmp.lt.s32.totalorder %v420_v14, 3  ;;  %vm75_vm4 = vcmp.lt.s32.totalorder %v420_v14, 2  ;;  %v58_v54 = vshrl.u32 %v384_v16, %v57_v15 }
  0x1a   :  { %v61_v33 = vor.u32 %v60_v26, %v59_v17  ;;  %v64_v34 = vor.u32 %v63_v27, %v62_v19  ;;  %v67_v35 = vor.u32 %v66_v28, %v65_v21  ;;  %v70_v36 = vor.u32 %v69_v29, %v68_v23 }
  0x1b   :  { %v73_v37 = vor.u32 %v72_v31, %v71_v25  ;;  %v365_v25 = vadd.f32 -1.0, %v16_v0 }
  0x1c   :  { %v82_v38 = vsel %vm74_vm1, %v61_v33, %v64_v34  ;;  %v83_v39 = vsel %vm77_vm2, %v70_v36, 920167782  ;;  %v86_v40 = vsel %vm74_vm1, %v64_v34, %v67_v35  ;;  %v78_v3 = vsel %vm74_vm1, %v58_v54, %v61_v33 }
  0x1d   :  { %v87_v41 = vsel %vm77_vm2, %v73_v37, 1326507024  ;;  %v84_v43 = vsel %vm76_vm3, %v67_v35, %v83_v39  ;;  %v79_v8 = vsel %vm77_vm2, %v67_v35, 2102212464  ;;  %v19_v33 = vsub.f32 1.0, %v365_v25 }
  0x1e   :  { %v88_v44 = vsel %vm76_vm3, %v70_v36, %v87_v41  ;;  %v85_v47 = vsel %vm75_vm4, %v82_v38, %v84_v43  ;;  %v80_v19 = vsel %vm76_vm3, %v64_v34, %v79_v8 }
  0x1f   :  { %v89_v48 = vsel %vm75_vm4, %v86_v40, %v88_v44  ;;  %v115_v51 = vand.u32 65535, %v85_v47  ;;  %v116_v53 = vshrl.u32 %v85_v47, 16  ;;  %v81_v28 = vsel %vm75_vm4, %v78_v3, %v80_v19 }
  0x20   :  { %v93_v49 = vand.u32 65535, %v89_v48  ;;  %v94_v50 = vshrl.u32 %v89_v48, 16  ;;  %v135_v35 = vmul.u32 %v423_v32, %v81_v28  ;;  %380 = vlog2.f32 %v19_v33 }
  0x21   :  { %v117_v58 = vmul.u32 %v115_v51, %v91_v45  ;;  %v118_v59 = vmul.u32 %v116_v53, %v91_v45  ;;  %v119_v60 = vmul.u32 %v115_v51, %v92_v46  ;;  %v120_v1 = vmul.u32 %v116_v53, %v92_v46 }
  0x22   :  { %v95_v55 = vmul.u32 %v93_v49, %v91_v45  ;;  %v96_v56 = vmul.u32 %v94_v50, %v91_v45  ;;  %v97_v57 = vmul.u32 %v93_v49, %v92_v46  ;;  %v98_v61 = vmul.u32 %v94_v50, %v92_v46 }
  0x23   :  { %v121_v2 = vshll.u32 %v118_v59, 16  ;;  %v123_v6 = vshll.u32 %v119_v60, 16  ;;  %v122_v17 = vshrl.u32 %v118_v59, 16  ;;  %v124_v23 = vshrl.u32 %v119_v60, 16 }
  0x24   :  { %v99_v62 = vshll.u32 %v96_v56, 16  ;;  %v101_v63 = vshll.u32 %v97_v57, 16  ;;  %v100_v12 = vshrl.u32 %v96_v56, 16  ;;  %v102_v20 = vshrl.u32 %v97_v57, 16 }
  0x25   :  { %vm125_vm6 = vc.u32 %v117_v58, %v121_v2  ;;  %v127_v11 = vadd.s32 %v121_v2, %v117_v58 }
  0x26   :  { %vm103_vm5 = vc.u32 %v95_v55, %v99_v62  ;;  %v105_v5 = vadd.s32 %v99_v62, %v95_v55  ;;  %v126_v15 = vsel %vm125_vm6, 1, %v390_v9  ;;  %v381_v40 = vpop.eup %380  ;;  %vm185_vm6 = vweird.f32 %v414_v4 }
  0x27   :  { %v104_v10 = vsel %vm103_vm5, 1, %v390_v9  ;;  %v128_v18 = vadd.s32 %v126_v15, %v120_v1  ;;  %vm129_vm8 = vc.u32 %v127_v11, %v123_v6  ;;  %v131_v27 = vadd.s32 %v127_v11, %v123_v6 }
  0x28   :  { %v106_v13 = vadd.s32 %v104_v10, %v98_v61  ;;  %vm107_vm7 = vc.u32 %v105_v5, %v101_v63  ;;  %v130_v22 = vsel %vm129_vm8, 1, %v390_v9  ;;  %v26_v43 = vmul.f32 0.6931472, %v381_v40 }
  0x29   :  { %v108_v16 = vsel %vm107_vm7, 1, %v390_v9  ;;  %v132_v24 = vadd.s32 %v130_v22, %v128_v18 }
  0x2a   :  { %v110_v21 = vadd.s32 %v108_v16, %v106_v13  ;;  %v458_v45 = vmul.f32 -2.0, %v26_v43 }
  0x2b   :  { %v133_v29 = vadd.s32 %v132_v24, %v122_v17 }
  0x2c   :  { %v111_v26 = vadd.s32 %v110_v21, %v100_v12  ;;  %382 = vrsqrt.f32 %v458_v45  ;;  %vm35_vm14 = vcmp.eq.f32.partialorder %v458_v45, inf  ;;  %vm37_vm1 = vcmp.eq.f32.partialorder %v458_v45, 0.0 }
  0x2d   :  { %v134_v31 = vadd.s32 %v133_v29, %v124_v23 }
  0x2e   :  { %v112_v30 = vadd.s32 %v111_v26, %v102_v20 }
  0x2f   :  { %v138_v36 = vadd.s32 1, %v134_v31 }
  0x30   :  { %vm137_vm9 = vc.u32 %v112_v30, %v131_v27  ;;  %v136_v32 = vadd.s32 %v131_v27, %v112_v30  ;;  %v38_v27 = vand.u32 2147483648, %v458_v45 }
  0x31   :  { %v139_v34 = vsel %vm137_vm9, %v138_v36, %v134_v31 }
  0x32   :  { %v140_v37 = vadd.s32 %v139_v34, %v135_v35  ;;  %v383_v54 = vpop.eup %382 }
  0x33   :  { %v29_v59 = vmul.f32 %v383_v54, %v458_v45 }
  0x34   :  { %v141_v38 = vadd.s32 536870912, %v140_v37 }
  0x35   :  { %v30_v62 = vmul.f32 %v383_v54, %v29_v59 }
  0x36   :  { %v142_v39 = vshrl.u32 %v141_v38, 30 }
  0x37   :  { %v31_v2 = vmul.f32 0.5, %v30_v62 }
  0x38   :  { %v143_v41 = vshll.u32 %v142_v39, 30  ;;  %v166_v63 = vsub.s32 4, %v142_v39 }
  0x39   :  { %v32_v11 = vsub.f32 1.5, %v31_v2 }
  0x3a   :  { %v144_v42 = vsub.s32 %v140_v37, %v143_v41  ;;  %v167_v3 = vsel %vm44_vm12, %v166_v63, %v142_v39  ;;  %v197_v41 = vstv %s488_s0 }
  0x3b   :  { %v169_v8 = vsel %vm43_vm13, 0, %v167_v3  ;;  %v33_v18 = vmul.f32 %v383_v54, %v32_v11 }
  0x3c   :  { %vm145_vm10 = vcmp.lt.s32.totalorder %v144_v42, 0  ;;  %v146_v14 = vsub.s32 0, %v144_v42  ;;  %v346_v15 = vadd.s32 3, %v169_v8  ;;  %v186_v7 = vand.u32 3, %v169_v8 }
  0x3d   :  { %v34_v24 = vmul.f32 %v33_v18, %v458_v45 }
  0x3e   :  { %v147_v44 = vsel %vm145_vm10, %v146_v14, %v144_v42  ;;  %v347_v21 = vand.u32 3, %v346_v15  ;;  %vm191_vm15 = vcmp.eq.s32.totalorder %v186_v7, 2  ;;  %vm187_vm2 = vcmp.lt.s32.totalorder %v186_v7, 2 }
  0x3f   :  { %v148_v46 = vclz %v147_v44  ;;  %v36_v30 = vsel %vm35_vm14, %v458_v45, %v34_v24  ;;  %vm188_vm3 = vcmp.eq.s32.totalorder %v186_v7, 0  ;;  %v41_v44 = vld [vmem:[%s489_s1] sm:$0xff] }
  0x40   :  { %vm352_vm0 = vcmp.eq.s32.totalorder %v347_v21, 2  ;;  %vm349_vm4 = vcmp.eq.s32.totalorder %v347_v21, 0  ;;  %vm348_vm5 = vcmp.lt.s32.totalorder %v347_v21, 2  ;;  %v39_v36 = vsel %vm37_vm1, %v38_v27, %v36_v30 }
  0x41   :  { %v368_v47 = vadd.s32 4294967294, %v148_v46 }
  0x43   :  { %vm369_vm11 = vcmp.lt.s32.totalorder %v368_v47, 0 }
  0x44   :  { %v151_v48 = vsel %vm369_vm11, 0, %v368_v47 }
  0x45   :  { %v152_v49 = vsub.s32 32, %v151_v48  ;;  %v153_v50 = vshll.u32 %v144_v42, %v151_v48  ;;  %v156_v51 = vsub.s32 4294967266, %v151_v48 }
  0x47   :  { %v154_v52 = vshrl.u32 %v136_v32, %v152_v49  ;;  %v157_v53 = vadd.s32 127, %v156_v51 }
  0x49   :  { %v155_v55 = vor.u32 %v154_v52, %v153_v50  ;;  %v158_v56 = vshll.u32 %v157_v53, 23 }
  0x4b   :  { %v159_v57 = vor.u32 4788187, %v158_v56  ;;  %v162_v58 = vcvt.s32.f32 %v155_v55 }
  0x4d   :  { %v160_v60 = vand.u32 2147483647, %v159_v57 }
  0x4f   :  { %v163_v61 = vmul.f32 %v162_v58, %v160_v60 }
  0x51   :  { %v164_v0 = vxor.u32 2147483648, %v163_v61 }
  0x53   :  { %v165_v1 = vsel %vm44_vm12, %v164_v0, %v163_v61 }
  0x54   :  { %v168_v5 = vsel %vm43_vm13, %v414_v4, %v165_v1  ;;  %v201_v4 = vld [vmem:[%s489_s1 + $0x8] sm:$0xff] }
  0x55   :  { %v170_v6 = vmul.f32 %v168_v5, %v168_v5 }
  0x57   :  { %v171_v9 = vmul.f32 -0.001358992, %v170_v6  ;;  %v178_v10 = vmul.f32 -0.00019511016, %v170_v6 }
  0x59   :  { %v172_v12 = vadd.f32 0.041655596, %v171_v9  ;;  %v179_v13 = vadd.f32 0.008332121, %v178_v10 }
  0x5b   :  { %v173_v16 = vmul.f32 %v172_v12, %v170_v6  ;;  %v180_v17 = vmul.f32 %v179_v13, %v170_v6 }
  0x5d   :  { %v174_v19 = vadd.f32 -0.4999988, %v173_v16  ;;  %v181_v20 = vadd.f32 -0.16666654, %v180_v17 }
  0x5f   :  { %v175_v22 = vmul.f32 %v174_v19, %v170_v6  ;;  %v182_v23 = vmul.f32 %v181_v20, %v170_v6 }
  0x61   :  { %v176_v25 = vadd.f32 1.0, %v175_v22  ;;  %v183_v26 = vadd.f32 1.0, %v182_v23 }
  0x63   :  { %v184_v28 = vmul.f32 %v183_v26, %v168_v5  ;;  %v192_v29 = vxor.u32 2147483648, %v176_v25 }
  0x65   :  { %v189_v31 = vxor.u32 2147483648, %v184_v28  ;;  %v193_v33 = vsel %vm191_vm15, %v192_v29, %v184_v28  ;;  %v354_v35 = vsel %vm352_vm0, %v192_v29, %v184_v28 }
  0x67   :  { %v190_v34 = vsel %vm188_vm3, %v176_v25, %v189_v31  ;;  %v351_v37 = vsel %vm349_vm4, %v176_v25, %v189_v31 }
  0x68   :  { %v194_v38 = vsel %vm187_vm2, %v190_v34, %v193_v33  ;;  %v355_v39 = vsel %vm348_vm5, %v351_v37, %v354_v35 }
  0x69   :  { %v195_v40 = vsel %vm185_vm6, nan, %v194_v38  ;;  %v356_v42 = vsel %vm185_vm6, nan, %v355_v39 }
  0x6a   :  { %v196_v43 = vmul.f32 %v195_v40, %v39_v36  ;;  %v357_v14 = vmul.f32 %v356_v42, %v39_v36 }
  0x6c   :  { %v198_v45 = vmul.f32 %v197_v41, %v196_v43  ;;  %v358_v46 = vmul.f32 %v357_v14, %v197_v41 }
  0x6e   :  { %v199_v47 = vadd.f32 %v198_v45, %v41_v44  ;;  %v359_v32 = vadd.f32 %v358_v46, %v201_v4 }
  0x70   :  { %200 = vst [vmem:[%s490_s3] sm:$0xff] %v199_v47 }
  0x71   :  { %360 = vst [vmem:[%s490_s3 + $0x8] sm:$0xff] %v359_v32 }

</bundles_post_ra>
